<compile_context>
chip_gen: v7x
topology: tpu7x:2x2x1
jax: 0.10.0
libtpu: 0.0.40
codegen_flags: <defaults>
</compile_context>

<pallas_src>
import functools

import jax
import jax.numpy as jnp
import numpy as np
from jax.experimental import pallas as pl
from jax.experimental.pallas import tpu as pltpu


# ----------------------------------------------------------------------------
# Pallas kernel
# ----------------------------------------------------------------------------
def _raster_kernel(count_ref, flist_ref, plane_ref, out_ref, *,
                   n_ch, silhouette, th, tw, height, width,
                   pstride, n_ti, n_tj, list_stride):
    """Rasterize + interpolate one (th, tw) pixel tile of one batch element.

    count_ref : SMEM int32 (B*n_tiles,)        per-tile overlapping-face count
    flist_ref : SMEM int32 (B*n_tiles*F,)      per-tile compact global face ids
    plane_ref : SMEM f32   (B*F*pstride,)      per-face plane coefficients
                silhouette: [ua,ub,uc, va,vb,vc]
                general   : [ua..vc, za,zb,zc, c0a,c0b,c0c, c1a,...]
    out_ref   : VMEM (C, th, tw) tile of the NCHW output.
    """
    b = pl.program_id(0)
    ti = pl.program_id(1)
    tj = pl.program_id(2)
    tile = (b * n_ti + ti) * n_tj + tj

    row = jax.lax.broadcasted_iota(jnp.int32, (th, tw), 0).astype(jnp.float32)
    col = jax.lax.broadcasted_iota(jnp.int32, (th, tw), 1).astype(jnp.float32)
    py = (row + ti * th + 0.5) * (2.0 / height) - 1.0
    px = (col + tj * tw + 0.5) * (2.0 / width) - 1.0

    count = count_ref[tile]          # dynamic trip count (binned faces only)
    lbase = tile * list_stride

    if silhouette:
        # coverage carried in vregs as f32 (avoids i1 carry layouts); written once.
        def body(k, cov):
            fid = flist_ref[lbase + k]
            bp = fid * pstride
            ua = plane_ref[bp + 0]; ub = plane_ref[bp + 1]; uc = plane_ref[bp + 2]
            va = plane_ref[bp + 3]; vb = plane_ref[bp + 4]; vc = plane_ref[bp + 5]
            u = ua * px + ub * py + uc
            v = va * px + vb * py + vc
            w = 1.0 - u - v
            inside = (u >= 0.0) & (v >= 0.0) & (w >= 0.0)
            return jnp.where(inside, 1.0, cov)

        cov = jax.lax.fori_loop(0, count, body,
                                jnp.zeros((th, tw), jnp.float32))
        out_ref[0] = cov
    else:
        # carry = (zbuf, color_0, ..., color_{C-1}) entirely in vregs.
        def body(k, carry):
            zbuf = carry[0]
            cols = carry[1:]
            fid = flist_ref[lbase + k]
            bp = fid * pstride
            ua = plane_ref[bp + 0]; ub = plane_ref[bp + 1]; uc = plane_ref[bp + 2]
            va = plane_ref[bp + 3]; vb = plane_ref[bp + 4]; vc = plane_ref[bp + 5]
            za = plane_ref[bp + 6]; zb = plane_ref[bp + 7]; zc = plane_ref[bp + 8]
            u = ua * px + ub * py + uc
            v = va * px + vb * py + vc
            w = 1.0 - u - v
            z = za * px + zb * py + zc
            take = (u >= 0.0) & (v >= 0.0) & (w >= 0.0) & (z < zbuf)
            new_zbuf = jnp.where(take, z, zbuf)
            new_cols = []
            for c in range(n_ch):            # n_ch is static (small)
                ca = plane_ref[bp + 9 + 3 * c + 0]
                cb = plane_ref[bp + 9 + 3 * c + 1]
                cc = plane_ref[bp + 9 + 3 * c + 2]
                val = ca * px + cb * py + cc
                new_cols.append(jnp.where(take, val, cols[c]))
            return (new_zbuf, *new_cols)

        init = (jnp.full((th, tw), 1e30, jnp.float32),) + tuple(
            jnp.zeros((th, tw), jnp.float32) for _ in range(n_ch))
        final = jax.lax.fori_loop(0, count, body, init)
        for c in range(n_ch):                # one lane-dense store per channel
            out_ref[c] = final[1 + c]


# ----------------------------------------------------------------------------
# JAX glue: per-face plane coefficients, per-tile face binning
# ----------------------------------------------------------------------------
def _face_planes(ndc_vertices, faces, vertex_colors):
    """Per-face plane coefficients (shared by the kernel glue and reference)."""
    B = ndc_vertices.shape[0]
    Fn = faces.shape[0]
    # TODO(synk): nvdiffrast clips vertices with w <= 0 before the divide; the
    # perspective divide here is unguarded (faces behind the camera misbehave).
    w_clip = ndc_vertices[..., 3:4]
    ndc = (ndc_vertices[..., :3] / w_clip).astype(jnp.float32)        # (B, V, 3)
    tri = jnp.take(ndc, faces.reshape(-1), axis=1).reshape(B, Fn, 3, 3)
    x0, y0, z0 = tri[..., 0, 0], tri[..., 0, 1], tri[..., 0, 2]
    x1, y1, z1 = tri[..., 1, 0], tri[..., 1, 1], tri[..., 1, 2]
    x2, y2, z2 = tri[..., 2, 0], tri[..., 2, 1], tri[..., 2, 2]

    area = (x1 - x0) * (y2 - y0) - (y1 - y0) * (x2 - x0)
    valid = jnp.abs(area) > 1e-12
    inv_area = jnp.where(valid, 1.0 / jnp.where(valid, area, 1.0), 0.0)

    # e1 = (x2-x1)*(py-y1) - (y2-y1)*(px-x1);  u = e1 / area   (weight of v0)
    ua = -(y2 - y1) * inv_area
    ub = (x2 - x1) * inv_area
    uc = ((y2 - y1) * x1 - (x2 - x1) * y1) * inv_area
    # e2 = (x0-x2)*(py-y2) - (y0-y2)*(px-x2);  v = e2 / area   (weight of v1)
    va = -(y0 - y2) * inv_area
    vb = (x0 - x2) * inv_area
    vc = ((y0 - y2) * x2 - (x0 - x2) * y2) * inv_area
    # degenerate faces can never pass the inside test (u == -1 everywhere)
    uc = jnp.where(valid, uc, -1.0)

    planes = dict(ua=ua, ub=ub, uc=uc, va=va, vb=vb, vc=vc,
                  xs=tri[..., :, 0], ys=tri[..., :, 1], valid=valid)

    if vertex_colors is not None:
        # z = u*z0 + v*z1 + (1-u-v)*z2 as a plane in (px, py)
        za = ua * (z0 - z2) + va * (z1 - z2)
        zb = ub * (z0 - z2) + vb * (z1 - z2)
        zc = uc * (z0 - z2) + vc * (z1 - z2) + z2
        C = vertex_colors.shape[-1]
        cols = jnp.take(vertex_colors.astype(jnp.float32), faces.reshape(-1),
                        axis=1).reshape(B, Fn, 3, C)
        a0, a1, a2 = cols[..., 0, :], cols[..., 1, :], cols[..., 2, :]
        ca = ua[..., None] * (a0 - a2) + va[..., None] * (a1 - a2)
        cb = ub[..., None] * (a0 - a2) + vb[..., None] * (a1 - a2)
        cc = uc[..., None] * (a0 - a2) + vc[..., None] * (a1 - a2) + a2
        planes.update(za=za, zb=zb, zc=zc, ca=ca, cb=cb, cc=cc)
    return planes


def _prepare_face_data(ndc_vertices, faces, vertex_colors, H, W, TH, TW):
    """Flat plane table + per-tile face bins (counts + compact face-id lists)."""
    B = ndc_vertices.shape[0]
    Fn = faces.shape[0]
    silhouette = vertex_colors is None
    p = _face_planes(ndc_vertices, faces, vertex_colors)

    if silhouette:
        planes = jnp.stack([p["ua"], p["ub"], p["uc"],
                            p["va"], p["vb"], p["vc"]], axis=-1)       # (B,F,6)
    else:
        C = vertex_colors.shape[-1]
        base = jnp.stack([p["ua"], p["ub"], p["uc"],
                          p["va"], p["vb"], p["vc"],
                          p["za"], p["zb"], p["zc"]], axis=-1)         # (B,F,9)
        cpl = jnp.stack([p["ca"], p["cb"], p["cc"]], axis=-1)          # (B,F,C,3)
        cpl = cpl.reshape(B, Fn, 3 * C)
        planes = jnp.concatenate([base, cpl], axis=-1)                 # (B,F,9+3C)
    pstride = int(planes.shape[-1])

    # conservative per-face tile bounding boxes (tile-index space, padded 1 px)
    n_ti, n_tj = H // TH, W // TW
    xs, ys, valid = p["xs"], p["ys"], p["valid"]
    xmin, xmax = xs.min(-1), xs.max(-1)
    ymin, ymax = ys.min(-1), ys.max(-1)
    jlo = (xmin + 1.0) * (0.5 * W) - 1.5
    jhi = (xmax + 1.0) * (0.5 * W) + 0.5
    ilo = (ymin + 1.0) * (0.5 * H) - 1.5
    ihi = (ymax + 1.0) * (0.5 * H) + 0.5
    tj_min = jnp.clip(jnp.floor(jlo / TW), 0, n_tj - 1).astype(jnp.int32)
    tj_max = jnp.clip(jnp.floor(jhi / TW), 0, n_tj - 1).astype(jnp.int32)
    ti_min = jnp.clip(jnp.floor(ilo / TH), 0, n_ti - 1).astype(jnp.int32)
    ti_max = jnp.clip(jnp.floor(ihi / TH), 0, n_ti - 1).astype(jnp.int32)

    # degenerate or fully off-screen faces can never cover a pixel -> no tiles
    cull = ((~valid) | (xmax < -1.0) | (xmin > 1.0) |
            (ymax < -1.0) | (ymin > 1.0))
    tj_min = jnp.where(cull, jnp.int32(n_tj), tj_min)

    # ---- per-tile face binning -------------------------------------------
    ti_idx = jnp.arange(n_ti, dtype=jnp.int32)
    tj_idx = jnp.arange(n_tj, dtype=jnp.int32)
    ov = ((tj_idx[None, None, :, None] >= tj_min[:, None, None, :]) &
          (tj_idx[None, None, :, None] <= tj_max[:, None, None, :]) &
          (ti_idx[None, :, None, None] >= ti_min[:, None, None, :]) &
          (ti_idx[None, :, None, None] <= ti_max[:, None, None, :]))  # (B,ti,tj,F)
    ov = ov.reshape(B, n_ti * n_tj, Fn)
    counts = ov.sum(axis=-1).astype(jnp.int32)                         # (B,T)
    # stable argsort of (not overlap) -> overlapping face ids first, in the
    # original face order (keeps depth-test tie-breaking identical to the ref).
    order = jnp.argsort((~ov).astype(jnp.int32), axis=-1,
                        stable=True).astype(jnp.int32)                 # (B,T,F)
    gids = order + (jnp.arange(B, dtype=jnp.int32) * Fn)[:, None, None]

    # TODO(synk): for very large meshes the flat SMEM plane / face-list tables
    # exceed SMEM (1-D refs pad to next_pow2); chunk faces through HBM
    # (memory_space=pl.ANY + make_async_copy) or add a face-chunk grid axis.
    return (counts.reshape(-1),
            gids.reshape(-1),
            planes.reshape(-1).astype(jnp.float32),
            pstride)


def _pick_tile(H, W, C, B, silhouette, tile_h=None, tile_w=None):
    """Lane-dense tiles; tunable (sweep tile_h/tile_w per resolution & mesh)."""
    if tile_w is None:
        tile_w = 256 if W % 256 == 0 else 128
    if tile_h is None:
        max_pix = 8192 if (silhouette or C <= 1) else 4096
        tile_h = 8
        for cand in (64, 32, 16, 8):
            if H % cand == 0 and cand * tile_w <= max_pix:
                tile_h = cand
                break
    # v7x megacore: keep enough (balanced) grid steps so both TensorCores work.
    while (B * (H // tile_h) * (W // tile_w) < 4 and tile_h > 8
           and H % (tile_h // 2) == 0):
        tile_h //= 2
    return tile_h, tile_w


# ----------------------------------------------------------------------------
# Forward pass
# ----------------------------------------------------------------------------
def silhouette_forward(ndc_vertices, indices, vertex_colors=None,
                       resolution=(256, 512), tile_h=None, tile_w=None):
    faces = indices[0] if indices.ndim > 2 else indices
    faces = faces.astype(jnp.int32)
    B = ndc_vertices.shape[0]
    H, W = int(resolution[0]), int(resolution[1])
    assert H % 8 == 0 and W % 128 == 0, "resolution must tile into (8, 128)"

    silhouette = vertex_colors is None
    C = 1 if silhouette else int(vertex_colors.shape[-1])
    Fn = int(faces.shape[0])
    TH, TW = _pick_tile(H, W, C, B, silhouette, tile_h, tile_w)
    n_ti, n_tj = H // TH, W // TW

    counts, flist, planes, pstride = _prepare_face_data(
        ndc_vertices, faces, vertex_colors, H, W, TH, TW)

    kernel = functools.partial(
        _raster_kernel, n_ch=C, silhouette=silhouette, th=TH, tw=TW,
        height=H, width=W, pstride=pstride, n_ti=n_ti, n_tj=n_tj,
        list_stride=Fn)

    out = pl.pallas_call(
        kernel,
        out_shape=jax.ShapeDtypeStruct((B, C, H, W), jnp.float32),
        grid_spec=pltpu.PrefetchScalarGridSpec(
            num_scalar_prefetch=2,                    # counts, face list -> SMEM
            grid=(B, n_ti, n_tj),
            in_specs=[
                pl.BlockSpec(memory_space=pltpu.MemorySpace.SMEM),  # planes (f32)
            ],
            out_specs=pl.BlockSpec((None, C, TH, TW),
                                   lambda b, i, j, cnt, fl: (b, 0, i, j)),
        ),
        compiler_params=pltpu.CompilerParams(
            dimension_semantics=("parallel", "parallel", "parallel")),
    )(counts, flist, planes)
    # TODO(synk): dr.antialias (analytic edge antialiasing) has no clean Pallas
    # equivalent; this returns the hard-rasterized image (already NCHW, i.e.
    # the module's final permute).
    return out


class Silhouette:
    """JAX/Pallas port of kbody_adithya Silhouette (forward pass)."""

    def __init__(self, width: int = 512, height: int = 256,
                 position_gradient_scale: float = 1.0):
        self.resolution = (height, width)
        self.pos_grad_boost = position_gradient_scale  # backward-only; unused

    def __call__(self, ndc_vertices, indices, vertex_colors=None,
                 resolution_image=None):
        resolution = (self.resolution if resolution_image is None
                      else resolution_image.shape[2:])
        return silhouette_forward(ndc_vertices, indices, vertex_colors,
                                  resolution)


# ----------------------------------------------------------------------------
# Pure-JAX reference mirroring the kernel math (for correctness checking)
# ----------------------------------------------------------------------------
def _reference(ndc_vertices, indices, vertex_colors, resolution):
    faces = indices[0] if indices.ndim > 2 else indices
    faces = faces.astype(jnp.int32)
    B = ndc_vertices.shape[0]
    H, W = int(resolution[0]), int(resolution[1])
    silhouette = vertex_colors is None
    C = 1 if silhouette else vertex_colors.shape[-1]
    Fn = faces.shape[0]
    p = _face_planes(ndc_vertices, faces, vertex_colors)

    row = jnp.broadcast_to(jnp.arange(H, dtype=jnp.float32)[:, None], (H, W))
    col = jnp.broadcast_to(jnp.arange(W, dtype=jnp.float32)[None, :], (H, W))
    py = (row + 0.5) * (2.0 / H) - 1.0
    px = (col + 0.5) * (2.0 / W) - 1.0

    outs = []
    for b in range(B):
        color = jnp.zeros((C, H, W), jnp.float32)
        best = jnp.full((H, W), 1e30, jnp.float32)
        for f in range(Fn):
            u = p["ua"][b, f] * px + p["ub"][b, f] * py + p["uc"][b, f]
            v = p["va"][b, f] * px + p["vb"][b, f] * py + p["vc"][b, f]
            w = 1.0 - u - v
            inside = (u >= 0.0) & (v >= 0.0) & (w >= 0.0)
            if silhouette:
                color = color.at[0].set(jnp.where(inside, 1.0, color[0]))
            else:
                z = p["za"][b, f] * px + p["zb"][b, f] * py + p["zc"][b, f]
                take = inside & (z < best)
                best = jnp.where(take, z, best)
                chans = []
                for c in range(C):
                    val = (p["ca"][b, f, c] * px + p["cb"][b, f, c] * py
                           + p["cc"][b, f, c])
                    chans.append(jnp.where(take, val, color[c]))
                color = jnp.stack(chans, axis=0)
        outs.append(color)
    return jnp.stack(outs, axis=0)


if __name__ == "__main__":
    key = jax.random.PRNGKey(0)
    B, V = 2, 8           # batch, vertices
    H, W = 64, 256        # small resolution, tiles into (8, 128)

    k1, k2, k3 = jax.random.split(key, 3)
    xy = jax.random.uniform(k1, (B, V, 2), minval=-0.9, maxval=0.9,
                            dtype=jnp.float32)
    z = jax.random.uniform(k2, (B, V, 1), minval=0.1, maxval=0.9,
                           dtype=jnp.float32)
    wclip = jnp.ones((B, V, 1), jnp.float32)
    ndc_vertices = jnp.concatenate([xy, z, wclip], axis=-1)   # (B, V, 4) clip space

    # deterministic, non-degenerate triangle connectivity
    indices = jnp.array([[0, 1, 2], [2, 3, 4], [4, 5, 6],
                         [6, 7, 0], [1, 3, 5], [0, 2, 4]], dtype=jnp.int32)

    module = Silhouette(width=W, height=H)

    # silhouette (coverage) fast path: vertex_colors=None
    out = jax.block_until_ready(module(ndc_vertices, indices))
    assert out.shape == (B, 1, H, W), out.shape
    ref = jax.block_until_ready(_reference(ndc_vertices, indices, None, (H, W)))
    np.testing.assert_allclose(np.asarray(out), np.asarray(ref), atol=1e-4, rtol=0)

    # general path: depth-tested barycentric colour interpolation (C = 3)
    vcol = jax.random.uniform(k3, (B, V, 3), dtype=jnp.float32)
    out_c = jax.block_until_ready(module(ndc_vertices, indices, vcol))
    assert out_c.shape == (B, 3, H, W), out_c.shape
    ref_c = jax.block_until_ready(_reference(ndc_vertices, indices, vcol, (H, W)))
    np.testing.assert_allclose(np.asarray(out_c), np.asarray(ref_c),
                               atol=1e-4, rtol=0)

    print("KERNEL_OK")
</pallas_src>

<mosaic_0001>
module attributes {stable_mosaic.version = 11 : i64} {
  func.func @_raster_kernel(%arg0: i32, %arg1: i32, %arg2: i32, %arg3: memref<4xi32, #tpu.memory_space<smem>>, %arg4: memref<24xi32, #tpu.memory_space<smem>>, %arg5: memref<72xf32, #tpu.memory_space<smem>>, %arg6: memref<1x1x32x256xf32, #tpu.memory_space<vmem>>) attributes {dimension_semantics = [#tpu.dimension_semantics<parallel>, #tpu.dimension_semantics<parallel>, #tpu.dimension_semantics<parallel>], iteration_bounds = array<i64: 2, 2, 1>, scalar_prefetch = 2 : i64, scratch_operands = 0 : i64, tpu.core_type = #tpu.core_type<tc>, window_params = [{transform_indices = @transform_0, window_bounds = array<i64: 72>}, {transform_indices = @transform_1, window_bounds = array<i64: 1, 1, 32, 256>}]} {
    %c2_i32 = arith.constant 2 : i32
    %0 = arith.muli %arg0, %c2_i32 : i32
    %1 = arith.addi %0, %arg1 : i32
    %c1_i32 = arith.constant 1 : i32
    %2 = arith.muli %1, %c1_i32 : i32
    %3 = arith.addi %2, %arg2 : i32
    %4 = tpu.iota {dimensions = array<i32: 0>} : vector<32x256xi32>
    %5 = arith.sitofp %4 : vector<32x256xi32> to vector<32x256xf32>
    %6 = tpu.iota {dimensions = array<i32: 1>} : vector<32x256xi32>
    %7 = arith.sitofp %6 : vector<32x256xi32> to vector<32x256xf32>
    %c32_i32 = arith.constant 32 : i32
    %8 = arith.muli %arg1, %c32_i32 : i32
    %9 = arith.sitofp %8 : i32 to f32
    %10 = vector.broadcast %9 : f32 to vector<32x256xf32>
    %11 = arith.addf %5, %10 : vector<32x256xf32>
    %cst = arith.constant 5.000000e-01 : f32
    %12 = vector.broadcast %cst : f32 to vector<32x256xf32>
    %13 = arith.addf %11, %12 : vector<32x256xf32>
    %cst_0 = arith.constant 3.125000e-02 : f32
    %14 = vector.broadcast %cst_0 : f32 to vector<32x256xf32>
    %15 = arith.mulf %13, %14 : vector<32x256xf32>
    %cst_1 = arith.constant 1.000000e+00 : f32
    %16 = vector.broadcast %cst_1 : f32 to vector<32x256xf32>
    %17 = arith.subf %15, %16 : vector<32x256xf32>
    %c256_i32 = arith.constant 256 : i32
    %18 = arith.muli %arg2, %c256_i32 : i32
    %19 = arith.sitofp %18 : i32 to f32
    %20 = vector.broadcast %19 : f32 to vector<32x256xf32>
    %21 = arith.addf %7, %20 : vector<32x256xf32>
    %cst_2 = arith.constant 5.000000e-01 : f32
    %22 = vector.broadcast %cst_2 : f32 to vector<32x256xf32>
    %23 = arith.addf %21, %22 : vector<32x256xf32>
    %cst_3 = arith.constant 7.812500e-03 : f32
    %24 = vector.broadcast %cst_3 : f32 to vector<32x256xf32>
    %25 = arith.mulf %23, %24 : vector<32x256xf32>
    %cst_4 = arith.constant 1.000000e+00 : f32
    %26 = vector.broadcast %cst_4 : f32 to vector<32x256xf32>
    %27 = arith.subf %25, %26 : vector<32x256xf32>
    %28 = arith.index_cast %3 : i32 to index
    %29 = memref.load %arg3[%28] : memref<4xi32, #tpu.memory_space<smem>>
    %c6_i32 = arith.constant 6 : i32
    %30 = arith.muli %3, %c6_i32 : i32
    %cst_5 = arith.constant 0.000000e+00 : f32
    %31 = vector.broadcast %cst_5 : f32 to vector<32x256xf32>
    %c0_i32 = arith.constant 0 : i32
    %32 = arith.subi %29, %c0_i32 : i32
    %33 = arith.addi %c0_i32, %32 : i32
    %c1_i32_6 = arith.constant 1 : i32
    %34 = scf.for %arg7 = %c0_i32 to %33 step %c1_i32_6 iter_args(%arg8 = %31) -> (vector<32x256xf32>)  : i32 {
      %38 = arith.addi %30, %arg7 : i32
      %39 = arith.index_cast %38 : i32 to index
      %40 = memref.load %arg4[%39] : memref<24xi32, #tpu.memory_space<smem>>
      %c6_i32_10 = arith.constant 6 : i32
      %41 = arith.muli %40, %c6_i32_10 : i32
      %c0_i32_11 = arith.constant 0 : i32
      %42 = arith.addi %41, %c0_i32_11 : i32
      %43 = arith.index_cast %42 : i32 to index
      %44 = memref.load %arg5[%43] : memref<72xf32, #tpu.memory_space<smem>>
      %c1_i32_12 = arith.constant 1 : i32
      %45 = arith.addi %41, %c1_i32_12 : i32
      %46 = arith.index_cast %45 : i32 to index
      %47 = memref.load %arg5[%46] : memref<72xf32, #tpu.memory_space<smem>>
      %c2_i32_13 = arith.constant 2 : i32
      %48 = arith.addi %41, %c2_i32_13 : i32
      %49 = arith.index_cast %48 : i32 to index
      %50 = memref.load %arg5[%49] : memref<72xf32, #tpu.memory_space<smem>>
      %c3_i32 = arith.constant 3 : i32
      %51 = arith.addi %41, %c3_i32 : i32
      %52 = arith.index_cast %51 : i32 to index
      %53 = memref.load %arg5[%52] : memref<72xf32, #tpu.memory_space<smem>>
      %c4_i32 = arith.constant 4 : i32
      %54 = arith.addi %41, %c4_i32 : i32
      %55 = arith.index_cast %54 : i32 to index
      %56 = memref.load %arg5[%55] : memref<72xf32, #tpu.memory_space<smem>>
      %c5_i32 = arith.constant 5 : i32
      %57 = arith.addi %41, %c5_i32 : i32
      %58 = arith.index_cast %57 : i32 to index
      %59 = memref.load %arg5[%58] : memref<72xf32, #tpu.memory_space<smem>>
      %60 = vector.broadcast %44 : f32 to vector<32x256xf32>
      %61 = arith.mulf %60, %27 : vector<32x256xf32>
      %62 = vector.broadcast %47 : f32 to vector<32x256xf32>
      %63 = arith.mulf %62, %17 : vector<32x256xf32>
      %64 = arith.addf %61, %63 : vector<32x256xf32>
      %65 = vector.broadcast %50 : f32 to vector<32x256xf32>
      %66 = arith.addf %64, %65 : vector<32x256xf32>
      %67 = vector.broadcast %53 : f32 to vector<32x256xf32>
      %68 = arith.mulf %67, %27 : vector<32x256xf32>
      %69 = vector.broadcast %56 : f32 to vector<32x256xf32>
      %70 = arith.mulf %69, %17 : vector<32x256xf32>
      %71 = arith.addf %68, %70 : vector<32x256xf32>
      %72 = vector.broadcast %59 : f32 to vector<32x256xf32>
      %73 = arith.addf %71, %72 : vector<32x256xf32>
      %cst_14 = arith.constant 1.000000e+00 : f32
      %74 = vector.broadcast %cst_14 : f32 to vector<32x256xf32>
      %75 = arith.subf %74, %66 : vector<32x256xf32>
      %76 = arith.subf %75, %73 : vector<32x256xf32>
      %cst_15 = arith.constant 0.000000e+00 : f32
      %77 = vector.broadcast %cst_15 : f32 to vector<32x256xf32>
      %78 = arith.cmpf oge, %66, %77 : vector<32x256xf32>
      %cst_16 = arith.constant 0.000000e+00 : f32
      %79 = vector.broadcast %cst_16 : f32 to vector<32x256xf32>
      %80 = arith.cmpf oge, %73, %79 : vector<32x256xf32>
      %81 = arith.andi %78, %80 : vector<32x256xi1>
      %cst_17 = arith.constant 0.000000e+00 : f32
      %82 = vector.broadcast %cst_17 : f32 to vector<32x256xf32>
      %83 = arith.cmpf oge, %76, %82 : vector<32x256xf32>
      %84 = arith.andi %81, %83 : vector<32x256xi1>
      %cst_18 = arith.constant 1.000000e+00 : f32
      %85 = vector.broadcast %cst_18 : f32 to vector<32x256xf32>
      %86 = arith.select %84, %85, %arg8 : vector<32x256xi1>, vector<32x256xf32>
      scf.yield %86 : vector<32x256xf32>
    }
    %c0 = arith.constant 0 : index
    %c0_7 = arith.constant 0 : index
    %c0_8 = arith.constant 0 : index
    %c0_9 = arith.constant 0 : index
    %35 = vector.load %arg6[%c0, %c0_7, %c0_8, %c0_9] : memref<1x1x32x256xf32, #tpu.memory_space<vmem>>, vector<1x1x32x256xf32>
    %36 = vector.shape_cast %35 : vector<1x1x32x256xf32> to vector<32x256xf32>
    %37 = vector.shape_cast %34 : vector<32x256xf32> to vector<1x1x32x256xf32>
    tpu.vector_store %arg6[%c0, %c0_7, %c0_8, %c0_9], %37 {strides = array<i32>} : memref<1x1x32x256xf32, #tpu.memory_space<vmem>>, vector<1x1x32x256xf32>,
    return
  }
  func.func @transform_0(%arg0: i32, %arg1: i32, %arg2: i32, %arg3: memref<4xi32, #tpu.memory_space<smem>>, %arg4: memref<24xi32, #tpu.memory_space<smem>>) -> i32 {
    %c0_i32 = arith.constant 0 : i32
    %c0_i32_0 = arith.constant 0 : i32
    return %c0_i32 : i32
  }
  func.func @transform_1(%arg0: i32, %arg1: i32, %arg2: i32, %arg3: memref<4xi32, #tpu.memory_space<smem>>, %arg4: memref<24xi32, #tpu.memory_space<smem>>) -> (i32, i32, i32, i32) {
    %c0_i32 = arith.constant 0 : i32
    %c0_i32_0 = arith.constant 0 : i32
    return %arg0, %c0_i32, %arg1, %arg2 : i32, i32, i32, i32
  }
}

</mosaic_0001>

<bundles_post_ra>
// kernel: tpu_custom_call.1
= control target key start
LH: loop header
LB: loop body
LE: loop exit
PB: predicated region body
PF: predicated region fallthrough
CT: control target
= control target key end

     0   :  { %s1410_s0 = inlined_call_operand.hbm [shape: s32[4], index: 0, kind: input, shape index: {}]   ;;  %s1411_s2 = inlined_call_operand.vmem [shape: f32[72], index: 2, kind: input, shape index: {}]   ;;  %s1412_s3 = inlined_call_operand.hbm [shape: f32[2,1,64,256], index: 3, kind: output, shape index: {}]   ;;  %s1413_s1 = inlined_call_operand.vmem [shape: s32[24], index: 1, kind: input, shape index: {}]  }
   0x1   :  { %1417 = sst [smem:[#allocation14_spill]] %s1411_s2  ;;  %s718_s14 = scalar_lea.hbm %s1410_s0, 16 }
   0x2   :  { %p719_p0 = scmp.ne.s32.totalorder %s1410_s0, %s718_s14  ;;  %p722_p1 = scmp.lt.u32.totalorder %s718_s14, %s1410_s0 }
   0x4   :  { %p724_p2 = pnand %p722_p1, %p719_p0 }
   0x6   :  { %727 = shalt.err (!%p724_p2)  }
   0x7   :  { %s993_s19 = smov [#allocation3]   ;;  %s10_s24 = sshll.u32 %s1413_s1, 4  ;;  %s11_s24 = int_to_ptr.vmem [resolvable:$true] %s10_s24 }
   0x8   :  { %9 = dma.hbm_to_smem %s1410_s0, 16, %s993_s19, [#allocation2] }
   0x9   :  { %s728_s25 = scalar_lea.vmem %s11_s24, 16  ;;  %p733_p4 = scmp.lt.s32.totalorder %s11_s24, %s11_s24 }
   0xa   :  { %p729_p3 = scmp.ne.s32.totalorder %s11_s24, %s728_s25  ;;  %p734_p5 = scmp.lt.s32.totalorder %s728_s25, %s728_s25 }
   0xc   :  { %p735_p6 = por %p734_p5, %p733_p4 }
   0xe   :  { %p736_p7 = pnand %p735_p6, %p729_p3 }
  0x10   :  { %739 = shalt.err (!%p736_p7)  }
  0x11   :  { %s994_s26 = smov [#allocation4]  }
  0x12   :  { %13 = dma.vmem_to_smem %s11_s24, 16, %s994_s26, [#allocation2] }
  0x13   :  { %883 = dma.done.wait [#allocation2], 32 }
  0x14   :  { %884 = vsyncadd [#allocation2], 4294967264 }
  0x15   :  { %15 = sfence }
  0x16   :  { %16 = vsyncpa [#allocation7], 0 }
  0x17   :  { %17 = vsyncpa [#allocation6], 0 }
  0x18   :  { %19 = vsyncpa [#allocation6 + $0x1], 0  ;;  %s1034_s0 = smov 0   ;;  %s1036_s27 = smov 0  }
  0x19   :  { %s1038_s1 = smov 0   ;;  %s1040_s28 = smov 0  }
  0x1a   :  { %s1042_s29 = smov 0   ;;  %s1044_s30 = smov 0  }
  0x1b   :  { %s1046_s4 = smov 0   ;;  %s1048_s5 = smov 0  }
  0x1c LB: > { %s472_s6 = sadd.s32 4294967295, %s923_s5   ;;  %s473_s7 = sadd.s32 4294967294, %s923_s5   ;;  %s923_s5 = sphi %s1048_s5, %s25_s5   ;;  %s919_s4 = sphi %s1046_s4, %s1473_s4   ;;  %s915_s30 = sphi %s1044_s30, %s1472_s30   ;;  %s911_s29 = sphi %s1042_s29, %s1471_s29   ;;  %s907_s28 = sphi %s1040_s28, %s1470_s28   ;;  %s903_s1 = sphi %s1038_s1, %s1469_s1   ;;  %s899_s27 = sphi %s1036_s27, %s1468_s27   ;;  %s895_s0 = sphi %s1034_s0, %s1467_s0  }
  0x1d   : > { %s40_s8 = sadd.s32 1, %s915_s30  ;;  %s44_s9 = sadd.s32 1, %s919_s4 }
  0x1e   : > { %p42_p8 = scmp.ge.s32.totalorder %s40_s8, 2  ;;  %s76_s10 = sadd.s32 1, %s903_s1 }
  0x1f   : > { %p86_p9 = scmp.ne.s32.totalorder %s903_s1, %s899_s27  ;;  %p87_p10 = scmp.eq.s32.totalorder %s472_s6, 3 }
  0x20   : > { %s1475_s8 = smov (%p42_p8, %s40_s8), 0  ;;  %s1477_s9 = smov (!%p42_p8, %s44_s9), %s919_s4 }
  0x21   : > { %1418 = sst [smem:[#allocation12_spill]] %s1475_s8  ;;  %s70_s11 = ssub.s32 %s915_s30, %s1475_s8 }
  0x22   : > { %p1086_p11 = por %p87_p10, %p86_p9  ;;  %p46_p12 = scmp.ge.s32.totalorder %s1477_s9, 2 }
  0x23   : > { %p92_p13 = scmp.ne.s32.totalorder %s899_s27, %s895_s0  ;;  %p93_p0 = scmp.eq.s32.totalorder %s473_s7, 3 }
  0x24   : > { %p474_p1 = scmp.ge.s32.totalorder %s923_s5, 1  ;;  %s1479_s9 = smov (%p46_p12, %s1477_s9), 0 }
  0x25   : > { %1420 = sst [smem:[#allocation13_spill]] %s1479_s9  ;;  %p1095_p2 = por %p93_p0, %p92_p13 }
  0x26   : > { %p100_p3 = scmp.lt.s32.totalorder %s923_s5, 5  ;;  %s69_s14 = ssub.s32 %s919_s4, %s1479_s9 }
  0x27   : > { %s1421_s13 = scalar_select %p1095_p2, 1, 0 }
  0x28   : > { %s71_s15 = sor.u32 %s70_s11, %s69_s14  ;;  %p1102_p4 = pnand %p474_p1, %p100_p3 }
  0x29   : > { %p74_p5 = scmp.eq.s32.totalorder %s71_s15, 0  ;;  %p1106_p6 = scmp.eq.s32.totalorder %s472_s6, 0 }
  0x2a   : > { %p502_p7 = pneg %p1102_p4  ;;  %s1424_s2 = sld [smem:[#allocation14_spill]] }
  0x2b   : > { %s1116_s21 = scalar_select %p74_p5, %s903_s1, %s76_s10  }
  0x2c   : > { %p503_p8 = pnand %p1106_p6, %p502_p7 }
  0x2e   : > { %p742_p10 = pneg %p503_p8 }
  0x30   : > { %s113_s20 = sshll.u32 %s1424_s2, 4  ;;  %s114_s20 = int_to_ptr.vmem [resolvable:$true] %s113_s20 }
  0x31   : > { %s740_s22 = scalar_lea.vmem %s114_s20, 16  ;;  %p748_p0 = scmp.lt.s32.totalorder %s114_s20, %s114_s20 }
  0x32   : > { %p741_p9 = scmp.ne.s32.totalorder %s114_s20, %s740_s22  ;;  %p749_p1 = scmp.lt.s32.totalorder %s740_s22, %s740_s22 }
  0x34   : > { %p743_p12 = pnand %p742_p10, %p741_p9  ;;  %p750_p3 = por %p749_p1, %p748_p0 }
  0x36   : > { %p744_p13 = pneg %p743_p12 }
  0x38   : > { %p751_p2 = pnand %p750_p3, %p744_p13 }
  0x3a   : > { %754 = shalt.err (!%p751_p2)
}
  0x3b   : > { %s995_s23 = smov [#allocation5]   ;;  %126 = sbr.rel (%p1102_p4) target bundleno = 163 (0xa3), region = 24 }
  0x3c   : > { %505 = dma.vmem_to_smem (!%p503_p8), %s114_s20, 16, %s995_s23, [#allocation7]  }
  0x42   : > { %886 = dma.done.wait (%p1106_p6), [#allocation7], 16  }
  0x43   : > { %888 = vsyncadd (%p1106_p6), [#allocation7], 4294967280 }
  0x44   : > { %132 = sfence }
  0x45   : > { %s1414_s24 = sand.u32 1, %s899_s27   ;;  %s479_s25 = sshll.u32 %s911_s29, 1  ;;  %v147_v0 = vlaneseq  ;;  %v1156_v36 = vmov 0.0   ;;  %v1158_v37 = vmov 0.0   ;;  %v1160_v38 = vmov 0.0  }
  0x46   : > { %s1130_s26 = sshll.u32 %s1414_s24, 6  ;;  %s1133_s6 = sadd.s32 %s907_s28, %s479_s25  ;;  %v1162_v39 = vmov 0.0   ;;  %v1164_v40 = vmov 0.0   ;;  %v1166_v41 = vmov 0.0   ;;  %v1168_v42 = vmov 0.0  }
  0x47   : > { %v148_v1 = vshrl.u32 %v147_v0, 7  ;;  %v157_v2 = vand.u32 127, %v147_v0  ;;  %s480_s7 = sshll.u32 %s907_s28, 5  ;;  %s1137_s11 = sld [smem:[#allocation3 + %s1133_s6]]  ;;  %v1170_v43 = vmov 0.0  }
  0x48   : > { %s162_s10 = scvt.s32.f32 %s480_s7  ;;  %s192_s14 = smul.u32 6, %s1133_s6 }
  0x49   : > { %v149_v3 = vadd.s32 8, %v148_v1  ;;  %v150_v4 = vadd.s32 16, %v148_v1  ;;  %v151_v5 = vadd.s32 24, %v148_v1  ;;  %v152_v6 = vcvt.s32.f32 %v148_v1  ;;  %s1153_s15 = scalar_lea.vmem [#allocation8], %s1130_s26 }
  0x4a   : > { %v158_v7 = vadd.s32 128, %v157_v2  ;;  %v159_v8 = vcvt.s32.f32 %v157_v2  ;;  %v163_v9 = vstv %s162_s10 }
  0x4b   : > { %v153_v10 = vcvt.s32.f32 %v149_v3  ;;  %v154_v11 = vcvt.s32.f32 %v150_v4  ;;  %v155_v12 = vcvt.s32.f32 %v151_v5  ;;  %v164_v13 = vadd.f32 %v163_v9, %v152_v6 }
  0x4c   : > { %v160_v14 = vcvt.s32.f32 %v158_v7  ;;  %v185_v15 = vadd.f32 0.5, %v159_v8 }
  0x4d   : > { %v165_v16 = vadd.f32 %v163_v9, %v153_v10  ;;  %v166_v17 = vadd.f32 %v163_v9, %v154_v11  ;;  %v167_v18 = vadd.f32 %v163_v9, %v155_v12  ;;  %v168_v19 = vadd.f32 0.5, %v164_v13  ;;  %p487_p2 = scmp.le.s32.totalorder %s1137_s11, 0 }
  0x4e   : > { %v186_v20 = vadd.f32 0.5, %v160_v14  ;;  %v187_v21 = vmul.f32 0.0078125, %v185_v15  ;;  %v1172_v44 = vmov (!%p487_p2), 0.0   ;;  %v1174_v45 = vmov (!%p487_p2), 0.0   ;;  %s1188_s16 = smov (!%p487_p2), 0  }
  0x4f   : > { %v169_v22 = vadd.f32 0.5, %v165_v16  ;;  %v170_v23 = vadd.f32 0.5, %v166_v17  ;;  %v171_v24 = vadd.f32 0.5, %v167_v18  ;;  %v172_v25 = vmul.f32 0.03125, %v168_v19  ;;  %415 = sbr.rel (%p487_p2) target bundleno = 136 (0x88), region = 62 }
  0x50   : > { %v188_v26 = vmul.f32 0.0078125, %v186_v20  ;;  %v1140_v27 = vadd.f32 -1.0, %v187_v21  ;;  %v1176_v46 = vmov (!%p487_p2), 0.0   ;;  %v1178_v47 = vmov (!%p487_p2), 0.0  }
  0x51   : > { %v173_v28 = vmul.f32 0.03125, %v169_v22  ;;  %v174_v29 = vmul.f32 0.03125, %v170_v23  ;;  %v175_v30 = vmul.f32 0.03125, %v171_v24  ;;  %v1142_v31 = vadd.f32 -1.0, %v172_v25 }
  0x52   : > { %v1144_v32 = vadd.f32 -1.0, %v188_v26  ;;  %v1180_v48 = vmov (!%p487_p2), 0.0   ;;  %v1182_v49 = vmov (!%p487_p2), 0.0   ;;  %v1184_v50 = vmov (!%p487_p2), 0.0  }
  0x53   : > { %v1146_v33 = vadd.f32 -1.0, %v173_v28  ;;  %v1148_v34 = vadd.f32 -1.0, %v174_v29  ;;  %v1150_v35 = vadd.f32 -1.0, %v175_v30  ;;  %v1186_v51 = vmov (!%p487_p2), 0.0  }
  0x56 LB: >> { %s207_s17 = sadd.s32 %s959_s16, %s192_s14  ;;  %s196_s16 = sadd.s32 1, %s959_s16   ;;  %s959_s16 = sphi %s1188_s16, %s196_s16   ;;  %v955_v51 = vphi %v1186_v51, %v1454_v51   ;;  %v951_v50 = vphi %v1184_v50, %v1453_v50   ;;  %v947_v49 = vphi %v1182_v49, %v1452_v49   ;;  %v943_v48 = vphi %v1180_v48, %v1451_v48   ;;  %v939_v47 = vphi %v1178_v47, %v1450_v47   ;;  %v935_v46 = vphi %v1176_v46, %v1449_v46   ;;  %v931_v45 = vphi %v1174_v45, %v1448_v45   ;;  %v927_v44 = vphi %v1172_v44, %v1447_v44  }
  0x57   : >> { %s208_s18 = sld [smem:[#allocation4 + %s207_s17]]  ;;  %p195_p4 = scmp.ge.s32.totalorder %s196_s16, %s1137_s11 }
  0x5d   : >> { %s209_s19 = smul.u32 6, %s208_s18 }
  0x5f   : >> { %s211_s20 = sadd.s32 1, %s209_s19  ;;  %s210_s22 = sld [smem:[#allocation5 + %s209_s19]] }
  0x60   : >> { %s212_s23 = sld [smem:[#allocation5 + %s211_s20]]  ;;  %s215_s25 = sadd.s32 3, %s209_s19 }
  0x61   : >> { %s216_s26 = sld [smem:[#allocation5 + %s215_s25]]  ;;  %s217_s7 = sadd.s32 4, %s209_s19 }
  0x62   : >> { %s213_s10 = sadd.s32 2, %s209_s19  ;;  %s218_s24 = sld [smem:[#allocation5 + %s217_s7]] }
  0x63   : >> { %s219_s2 = sadd.s32 5, %s209_s19  ;;  %s214_s9 = sld [smem:[#allocation5 + %s213_s10]] }
  0x64   : >> { %s220_s8 = sld [smem:[#allocation5 + %s219_s2]] }
  0x65   : >> { %v221_v52 = vstv %s210_s22 }
  0x66   : >> { %v224_v53 = vstv %s212_s23  ;;  %v222_v55 = vmul.f32 %v1140_v27, %v221_v52  ;;  %v223_v56 = vmul.f32 %v1144_v32, %v221_v52 }
  0x67   : >> { %v246_v54 = vstv %s216_s26  ;;  %v225_v57 = vmul.f32 %v1142_v31, %v224_v53  ;;  %v226_v58 = vmul.f32 %v1146_v33, %v224_v53  ;;  %v227_v59 = vmul.f32 %v1148_v34, %v224_v53 }
  0x68   : >> { %v247_v60 = vmul.f32 %v1140_v27, %v246_v54  ;;  %v248_v61 = vmul.f32 %v1144_v32, %v246_v54  ;;  %v249_v62 = vstv %s218_s24  ;;  %v228_v63 = vmul.f32 %v1150_v35, %v224_v53 }
  0x69   : >> { %v250_v0 = vmul.f32 %v1142_v31, %v249_v62  ;;  %v251_v1 = vmul.f32 %v1146_v33, %v249_v62  ;;  %v229_v2 = vadd.f32 %v225_v57, %v222_v55  ;;  %v230_v3 = vadd.f32 %v225_v57, %v223_v56 }
  0x6a   : >> { %v231_v4 = vadd.f32 %v226_v58, %v222_v55  ;;  %v252_v5 = vmul.f32 %v1148_v34, %v249_v62  ;;  %v232_v6 = vadd.f32 %v226_v58, %v223_v56  ;;  %v233_v7 = vadd.f32 %v227_v59, %v222_v55 }
  0x6b   : >> { %v237_v8 = vstv %s214_s9  ;;  %v253_v9 = vmul.f32 %v1150_v35, %v249_v62  ;;  %v234_v10 = vadd.f32 %v227_v59, %v223_v56  ;;  %v254_v11 = vadd.f32 %v250_v0, %v247_v60 }
  0x6c   : >> { %v255_v12 = vadd.f32 %v250_v0, %v248_v61  ;;  %v256_v13 = vadd.f32 %v251_v1, %v247_v60  ;;  %v235_v14 = vadd.f32 %v228_v63, %v222_v55  ;;  %v236_v15 = vadd.f32 %v228_v63, %v223_v56 }
  0x6d   : >> { %v257_v16 = vadd.f32 %v251_v1, %v248_v61  ;;  %v262_v17 = vstv %s220_s8  ;;  %v238_v18 = vadd.f32 %v237_v8, %v229_v2  ;;  %v239_v19 = vadd.f32 %v237_v8, %v230_v3 }
  0x6e   : >> { %v240_v20 = vadd.f32 %v237_v8, %v231_v4  ;;  %v258_v21 = vadd.f32 %v252_v5, %v247_v60  ;;  %v241_v22 = vadd.f32 %v237_v8, %v232_v6  ;;  %v242_v23 = vadd.f32 %v237_v8, %v233_v7 }
  0x6f   : >> { %v259_v24 = vadd.f32 %v252_v5, %v248_v61  ;;  %v260_v25 = vadd.f32 %v253_v9, %v247_v60  ;;  %v243_v26 = vadd.f32 %v237_v8, %v234_v10  ;;  %v263_v28 = vadd.f32 %v262_v17, %v254_v11 }
  0x70   : >> { %v264_v29 = vadd.f32 %v262_v17, %v255_v12  ;;  %v265_v30 = vadd.f32 %v262_v17, %v256_v13  ;;  %v244_v36 = vadd.f32 %v237_v8, %v235_v14  ;;  %v245_v37 = vadd.f32 %v237_v8, %v236_v15 }
  0x71   : >> { %v261_v38 = vadd.f32 %v253_v9, %v248_v61  ;;  %v266_v39 = vadd.f32 %v262_v17, %v257_v16  ;;  %v267_v40 = vadd.f32 %v262_v17, %v258_v21  ;;  %v271_v41 = vsub.f32 1.0, %v238_v18 }
  0x72   : >> { %v272_v42 = vsub.f32 1.0, %v239_v19  ;;  %vm287_vm0 = vcmp.ge.f32.partialorder %v238_v18, 0.0  ;;  %v268_v43 = vadd.f32 %v262_v17, %v259_v24  ;;  %v269_v52 = vadd.f32 %v262_v17, %v260_v25 }
  0x73   : >> { %v273_v53 = vsub.f32 1.0, %v240_v20  ;;  %vm288_vm1 = vcmp.ge.f32.partialorder %v239_v19, 0.0  ;;  %vm289_vm2 = vcmp.ge.f32.partialorder %v240_v20, 0.0  ;;  %vm295_vm3 = vcmp.ge.f32.partialorder %v263_v28, 0.0 }
  0x74   : >> { %vm296_vm4 = vcmp.ge.f32.partialorder %v264_v29, 0.0  ;;  %vm297_vm5 = vcmp.ge.f32.partialorder %v265_v30, 0.0  ;;  %v270_v54 = vadd.f32 %v262_v17, %v261_v38  ;;  %v274_v55 = vsub.f32 1.0, %v241_v22  ;;  %vm1232_vm8 = vmand %vm287_vm0, %vm295_vm3 }
  0x75   : >> { %vm290_vm6 = vcmp.ge.f32.partialorder %v241_v22, 0.0  ;;  %vm298_vm7 = vcmp.ge.f32.partialorder %v266_v39, 0.0  ;;  %v275_v57 = vsub.f32 1.0, %v242_v23  ;;  %v279_v58 = vsub.f32 %v271_v41, %v263_v28  ;;  %vm1236_vm11 = vmand %vm288_vm1, %vm296_vm4 }
  0x76   : >> { %vm291_vm9 = vcmp.ge.f32.partialorder %v242_v23, 0.0  ;;  %vm299_vm10 = vcmp.ge.f32.partialorder %v267_v40, 0.0  ;;  %v276_v60 = vsub.f32 1.0, %v243_v26  ;;  %v280_v61 = vsub.f32 %v272_v42, %v264_v29  ;;  %vm1242_vm14 = vmand %vm289_vm2, %vm297_vm5 }
  0x77   : >> { %vm292_vm12 = vcmp.ge.f32.partialorder %v243_v26, 0.0  ;;  %vm300_vm13 = vcmp.ge.f32.partialorder %v268_v43, 0.0  ;;  %v1429_v62 = vmov 0  ;;  %v277_v63 = vsub.f32 1.0, %v244_v36  ;;  %vm1248_vm1 = vmand %vm290_vm6, %vm298_vm7 }
  0x78   : >> { %v1430_v62 = vsel %vm1242_vm14, 4294967295, %v1429_v62  ;;  %v281_v0 = vsub.f32 %v273_v53, %v265_v30  ;;  %vm293_vm15 = vcmp.ge.f32.partialorder %v244_v36, 0.0  ;;  %vm301_vm0 = vcmp.ge.f32.partialorder %v269_v52, 0.0  ;;  %vm1254_vm2 = vmand %vm291_vm9, %vm299_vm10 }
  0x79   : >> { %v1431_v1 = vmov 0  ;;  %v278_v2 = vsub.f32 1.0, %v245_v37  ;;  %v282_v3 = vsub.f32 %v274_v55, %v266_v39  ;;  %vm294_vm3 = vcmp.ge.f32.partialorder %v245_v37, 0.0  ;;  %vm1258_vm5 = vmand %vm292_vm12, %vm300_vm13 }
  0x7a   : >> { %v1432_v1 = vsel %vm1248_vm1, 4294967295, %v1431_v1  ;;  %vm302_vm4 = vcmp.ge.f32.partialorder %v270_v54, 0.0  ;;  %v1433_v4 = vmov 0  ;;  %v283_v5 = vsub.f32 %v275_v57, %v267_v40  ;;  %vm1262_vm6 = vmand %vm293_vm15, %vm301_vm0 }
  0x7b   : >> { %v1434_v4 = vsel %vm1254_vm2, 4294967295, %v1433_v4  ;;  %v1435_v6 = vmov 0  ;;  %vm311_vm14 = vcmp.ge.f32.partialorder %v279_v58, 0.0  ;;  %v284_v7 = vsub.f32 %v276_v60, %v268_v43  ;;  %vm1266_vm1 = vmand %vm294_vm3, %vm302_vm4 }
  0x7c   : >> { %v1436_v6 = vsel %vm1258_vm5, 4294967295, %v1435_v6  ;;  %v1437_v8 = vmov 0  ;;  %vm312_vm7 = vcmp.ge.f32.partialorder %v280_v61, 0.0  ;;  %v285_v9 = vsub.f32 %v277_v63, %v269_v52  ;;  %vm319_vm12 = vmand %vm1232_vm8, %vm311_vm14 }
  0x7d   : >> { %v1438_v8 = vsel %vm1262_vm6, 4294967295, %v1437_v8  ;;  %v1439_v10 = vmov 0  ;;  %vm313_vm9 = vcmp.ge.f32.partialorder %v281_v0, 0.0  ;;  %v286_v11 = vsub.f32 %v278_v2, %v270_v54  ;;  %vm320_vm5 = vmand %vm1236_vm11, %vm312_vm7 }
  0x7e   : >> { %v1440_v10 = vsel %vm1266_vm1, 4294967295, %v1439_v10  ;;  %vm314_vm10 = vcmp.ge.f32.partialorder %v282_v3, 0.0  ;;  %vm315_vm13 = vcmp.ge.f32.partialorder %v283_v5, 0.0  ;;  %v327_v12 = vsel %vm319_vm12, 1.0, %v955_v51  }
  0x7f   : >> { %vm316_vm15 = vcmp.ge.f32.partialorder %v284_v7, 0.0  ;;  %vm1441_vm0 = vnez %v1430_v62  ;;  %v328_v13 = vsel %vm320_vm5, 1.0, %v951_v50   ;;  %vm317_vm3 = vcmp.ge.f32.partialorder %v285_v9, 0.0 }
  0x80   : >> { %vm321_vm6 = vmand %vm1441_vm0, %vm313_vm9  ;;  %vm1442_vm4 = vnez %v1432_v1  ;;  %vm318_vm2 = vcmp.ge.f32.partialorder %v286_v11, 0.0  ;;  %vm1443_vm8 = vnez %v1434_v4  ;;  %vm1444_vm11 = vnez %v1436_v6 }
  0x81   : >> { %vm322_vm1 = vmand %vm1442_vm4, %vm314_vm10  ;;  %v329_v14 = vsel %vm321_vm6, 1.0, %v947_v49   ;;  %vm1445_vm9 = vnez %v1438_v8  ;;  %vm1446_vm10 = vnez %v1440_v10  ;;  %v1453_v50 = vmov %v328_v13  ;;  %198 = sbr.rel (!%p195_p4) target bundleno = 86 (0x56), region = 68 }
  0x82   : >> { %vm323_vm14 = vmand %vm1443_vm8, %vm315_vm13  ;;  %v330_v15 = vsel %vm322_vm1, 1.0, %v943_v48   ;;  %v1452_v49 = vmov %v329_v14  ;;  %v1454_v51 = vmov %v327_v12  ;;  %v1460_v41 = vmov (%p195_p4), %v329_v14 }
  0x83   : >> { %vm324_vm7 = vmand %vm1444_vm11, %vm316_vm15  ;;  %v331_v16 = vsel %vm323_vm14, 1.0, %v939_v47   ;;  %v1451_v48 = vmov %v330_v15  ;;  %v1459_v40 = vmov (%p195_p4), %v330_v15  ;;  %v1461_v42 = vmov (%p195_p4), %v328_v13 }
  0x84   : >> { %vm325_vm5 = vmand %vm1445_vm9, %vm317_vm3  ;;  %v332_v17 = vsel %vm324_vm7, 1.0, %v935_v46   ;;  %v1450_v47 = vmov %v331_v16  ;;  %v1458_v39 = vmov (%p195_p4), %v331_v16  ;;  %v1462_v43 = vmov (%p195_p4), %v327_v12 }
  0x85   : >> { %vm326_vm12 = vmand %vm1446_vm10, %vm318_vm2  ;;  %v333_v18 = vsel %vm325_vm5, 1.0, %v931_v45   ;;  %v1449_v46 = vmov %v332_v17  ;;  %v1457_v38 = vmov (%p195_p4), %v332_v17 }
  0x86   : >> { %v334_v19 = vsel %vm326_vm12, 1.0, %v927_v44   ;;  %v1448_v45 = vmov %v333_v18  ;;  %v1456_v37 = vmov (%p195_p4), %v333_v18 }
  0x87   : >> { %v1447_v44 = vmov %v334_v19  ;;  %v1455_v36 = vmov (%p195_p4), %v334_v19 }
  0x88 PF: > { %335 = vst [vmem:[%s1153_s15] sm:$0xff] %v991_v43  ;;  %336 = vst [vmem:[%s1153_s15 + $0x8] sm:$0xff] %v987_v42  ;;  %s495_s2 = sshll.u32 %s907_s28, 3  ;;  %s491_s8 = sshll.u32 %s911_s29, 4  ;;  %v991_v43 = vphi %v1170_v43, %v1462_v43   ;;  %v987_v42 = vphi %v1168_v42, %v1461_v42   ;;  %v983_v41 = vphi %v1166_v41, %v1460_v41   ;;  %v979_v40 = vphi %v1164_v40, %v1459_v40   ;;  %v975_v39 = vphi %v1162_v39, %v1458_v39   ;;  %v971_v38 = vphi %v1160_v38, %v1457_v38   ;;  %v967_v37 = vphi %v1158_v37, %v1456_v37   ;;  %v963_v36 = vphi %v1156_v36, %v1455_v36  }
  0x89   : > { %337 = vst [vmem:[%s1153_s15 + $0x10] sm:$0xff] %v983_v41  ;;  %338 = vst [vmem:[%s1153_s15 + $0x18] sm:$0xff] %v979_v40  ;;  %s362_s9 = sshll.u32 %s1153_s15, 4  ;;  %s359_s24 = sadd.s32 %s495_s2, %s491_s8  ;;  %s1349_s9 = int_to_ptr.vmem [resolvable:$true] %s362_s9 }
  0x8a   : > { %339 = vst [vmem:[%s1153_s15 + $0x20] sm:$0xff] %v975_v39  ;;  %340 = vst [vmem:[%s1153_s15 + $0x28] sm:$0xff] %v971_v38  ;;  %s492_s6 = sshll.u32 %s359_s24, 7  ;;  %s1463_s17 = sand.u32 1, %s899_s27  }
  0x8b   : > { %341 = vst [vmem:[%s1153_s15 + $0x30] sm:$0xff] %v967_v37  ;;  %342 = vst [vmem:[%s1153_s15 + $0x38] sm:$0xff] %v963_v36  ;;  %s1354_s16 = scalar_lea.hbm %s1412_s3, %s492_s6  ;;  %s1358_s18 = scalar_lea.sflag [#allocation6], %s1463_s17 }
  0x8c   : > { %s755_s19 = scalar_lea.vmem %s1349_s9, 1024  ;;  %s996_s28 = smov [#allocation8]  }
  0x8d   : > { %p756_p5 = scmp.ne.s32.totalorder %s1349_s9, %s755_s19  ;;  %s759_s29 = sshll.u32 %s996_s28, 4  ;;  %s760_s29 = int_to_ptr.vmem [resolvable:$false] %s759_s29 }
  0x8e   : > { %s761_s15 = scalar_lea.vmem %s760_s29, 2048  ;;  %p762_p8 = scmp.lt.s32.totalorder %s1349_s9, %s760_s29 }
  0x8f   : > { %p757_p6 = pnand %p756_p5, %p1086_p11  ;;  %p763_p9 = scmp.lt.s32.totalorder %s761_s15, %s755_s19 }
  0x91   : > { %p758_p7 = pneg %p757_p6  ;;  %p764_p10 = por %p763_p9, %p762_p8 }
  0x93   : > { %p765_p12 = pnand %p764_p10, %p758_p7 }
  0x95   : > { %768 = shalt.err (!%p765_p12)
}
  0x96   : > { %s769_s20 = scalar_lea.hbm %s1354_s16, 1024  ;;  %s773_s25 = scalar_lea.hbm %s1412_s3, 4096 }
  0x97   : > { %p770_p13 = scmp.ne.s32.totalorder %s1354_s16, %s769_s20  ;;  %p774_p3 = scmp.lt.u32.totalorder %s1354_s16, %s1412_s3 }
  0x98   : > { %p775_p2 = scmp.lt.u32.totalorder %s773_s25, %s769_s20  ;;  %p777_p5 = scmp.lt.u32.totalorder %s769_s20, %s1354_s16 }
  0x99   : > { %p771_p0 = pnand %p770_p13, %p1086_p11 }
  0x9a   : > { %p776_p4 = por %p775_p2, %p774_p3 }
  0x9b   : > { %p772_p1 = pneg %p771_p0 }
  0x9c   : > { %p778_p6 = por %p777_p5, %p776_p4 }
  0x9e   : > { %p779_p7 = pnand %p778_p6, %p772_p1 }
  0xa0   : > { %782 = shalt.err (!%p779_p7)
}
  0xa1   : > { %s997_s10 = smov 256   ;;  %s998_s2 = smov 16  }
  0xa2   : > { %500 = dma.vmem_to_hbm [thread:$0]  (%p1086_p11), %s1349_s9, 1024, %s1354_s16, %s1358_s18, %s997_s10, %s997_s10, %s998_s2  }
  0xa3 PF: > { %p512_p8 = scmp.ge.s32.totalorder %s923_s5, 2  ;;  %s377_s8 = sand.u32 1, %s895_s0  }
  0xa4   : > { %p1464_p9 = scmp.ne.s32.totalorder %s1421_s13, 0  ;;  %s378_s24 = scalar_lea.sflag [#allocation6], %s377_s8 }
  0xa6   : > { %p507_p10 = pnand %p512_p8, %p1464_p9 }
  0xa8   : > { %890 = dma.done.wait (!%p507_p10), %s378_s24, 1024  }
  0xa9   : > { %892 = vsyncadd (!%p507_p10), %s378_s24, 4294966272  ;;  %s25_s5 = sadd.s32 1, %s923_s5   ;;  %s1465_s12 = sld [smem:[#allocation12_spill]] }
  0xaa   : > { %p22_p12 = scmp.ge.s32.totalorder %s25_s5, 6   ;;  %s1466_s9 = sld [smem:[#allocation13_spill]] }
  0xab   : > { %s1467_s0 = smov %s899_s27  ;;  %s1468_s27 = smov %s903_s1 }
  0xac   : > { %s1469_s1 = smov %s1116_s21  ;;  %s1470_s28 = smov %s915_s30 }
  0xad   : > { %s1471_s29 = smov %s919_s4  ;;  %24 = sbr.rel (!%p22_p12) target bundleno = 28 (0x1c), region = 79 }
  0xaf   : > { %s1472_s30 = smov %s1465_s12 }
  0xb0   : > { %s1473_s4 = smov %s1466_s9 }
  0xb4   :  { %383 = vsyncpa [#allocation6], 1 }
  0xb5   :  { %385 = vsyncpa [#allocation6 + $0x1], 1 }
  0xb6   :  { %386 = vsyncpa [#allocation7], 1 }
  0xb7   :  { %388 = vsyncpa [#allocation7 + $0x1], 1 }

</bundles_post_ra>
